<compile_context>
chip_gen: v7x
topology: tpu7x:2x2x1
jax: 0.10.0
libtpu: 0.0.40
codegen_flags: <defaults>
</compile_context>

<pallas_src>
import functools

import jax
import jax.numpy as jnp
from jax import lax
from jax.experimental import pallas as pl
from jax.experimental.pallas import tpu as pltpu


# ----------------------------------------------------------------------------
# Kernels
# ----------------------------------------------------------------------------

def adain_rows_kernel(x_ref, st_ref, o_ref, *, eps, inv_hw):
    """Single-pass path: whole spatial extent resident per block.

    x_ref:  (Rt, HW)  rows = flattened (batch, channel) pairs, lane-dense HW
    st_ref: (Rt, 2)   per-row style [yA, yB] in f32
    o_ref:  (Rt, HW)
    """
    xf = x_ref[...].astype(jnp.float32)                       # (Rt, HW)
    # Instance-norm stats over the spatial (lane) axis: XLU sums * const.
    mu = jnp.sum(xf, axis=1, keepdims=True) * inv_hw          # (Rt, 1)
    ex2 = jnp.sum(xf * xf, axis=1, keepdims=True) * inv_hw    # (Rt, 1)
    # Same single-pass E[x^2]-mu^2 + clamp(min=0) formula as the PyTorch module.
    var = jnp.maximum(ex2 - mu * mu, 0.0)
    inv = lax.rsqrt(var + eps)                                # EUP slot

    st = st_ref[...].astype(jnp.float32)                      # (Rt, 2)
    a = st[:, 0:1] * inv                                      # yA * rsqrt(var+eps)
    b = st[:, 1:2] - mu * a                                   # yB - mu * a
    # Re-read x for the affine instead of keeping a block-sized f32 temp live.
    o_ref[...] = (x_ref[...].astype(jnp.float32) * a + b).astype(o_ref.dtype)


def adain_stats_kernel(x_ref, st_ref, ab_ref, sum_sc, sq_sc, *, eps, inv_hw):
    """Two-pass path, pass 1: accumulate sum/sumsq over HW tiles, emit (a, b).

    grid = (row_tiles, hw_tiles), hw axis is the reduction ("arbitrary") axis.
    x_ref: (Rt, HWt); st_ref: (Rt, 2); ab_ref: (Rt, 2) f32 output (a, b).
    """
    h = pl.program_id(1)

    @pl.when(h == 0)
    def _():
        sum_sc[...] = jnp.zeros_like(sum_sc)
        sq_sc[...] = jnp.zeros_like(sq_sc)

    xf = x_ref[...].astype(jnp.float32)
    sum_sc[...] += jnp.sum(xf, axis=1, keepdims=True)
    sq_sc[...] += jnp.sum(xf * xf, axis=1, keepdims=True)

    @pl.when(h == pl.num_programs(1) - 1)
    def _():
        mu = sum_sc[...] * inv_hw
        var = jnp.maximum(sq_sc[...] * inv_hw - mu * mu, 0.0)
        inv = lax.rsqrt(var + eps)
        st = st_ref[...].astype(jnp.float32)
        a = st[:, 0:1] * inv
        b = st[:, 1:2] - mu * a
        ab_ref[:, 0:1] = a
        ab_ref[:, 1:2] = b


def adain_apply_kernel(x_ref, ab_ref, o_ref):
    """Two-pass path, pass 2: out = x * a + b per row."""
    ab = ab_ref[...]                                          # (Rt, 2) f32
    a = ab[:, 0:1]
    b = ab[:, 1:2]
    o_ref[...] = (x_ref[...].astype(jnp.float32) * a + b).astype(o_ref.dtype)


# ----------------------------------------------------------------------------
# Tiling / VMEM helpers
# ----------------------------------------------------------------------------

def _vmem_limit_bytes():
    """Compiler VMEM allowance with headroom; honors v7x's 64 MiB per-TC VMEM."""
    try:
        cap = int(pltpu.get_tpu_info().vmem_capacity_bytes)
    except Exception:  # pragma: no cover - conservative fallback
        cap = 64 * 1024 * 1024
    return max(32 << 20, min(cap - (16 << 20), 100 << 20))


def _sublane_multiple(itemsize):
    # Native second-to-last tile dim: 8 (f32), 16 (bf16/f16), 32 (int8/fp8).
    return {4: 8, 2: 16, 1: 32}.get(itemsize, 8)


def _pick_row_tile(n_rows, hw, itemsize, sublane, target_bytes):
    """Largest divisor Rt of n_rows (multiple of `sublane` or == n_rows) whose
    (Rt, hw) block fits `target_bytes`.  Returns (Rt, fits)."""
    cands = [r for r in range(1, n_rows + 1)
             if n_rows % r == 0 and (r % sublane == 0 or r == n_rows)]
    fitting = [r for r in cands if r * hw * itemsize <= target_bytes]
    if not fitting:
        return min(cands), False
    # Prefer a tile giving >=2 grid steps so both v7x TensorCores get work.
    multi = [r for r in fitting if n_rows // r >= 2]
    return (max(multi) if multi else max(fitting)), True


def _pick_hw_tile(hw, rt, itemsize, target_bytes):
    """Largest multiple of 128 dividing hw whose (rt, hwt) block fits target."""
    best = 128
    for hwt in range(128, hw + 1, 128):
        if hw % hwt == 0 and rt * hwt * itemsize <= target_bytes:
            best = max(best, hwt)
    return best


# ----------------------------------------------------------------------------
# Forward wrapper
# ----------------------------------------------------------------------------

def adain_forward(x, y, weight, bias, dim_out, eps=1e-8, max_block_bytes=None):
    """x: (B, C, H, W) NCHW; y: (B, dimIn); weight: (2*dimOut, dimIn); bias: (2*dimOut,)."""
    B, C, H, W = x.shape
    assert C == dim_out
    HW = H * W
    BC = B * C
    dim_in = y.shape[1]
    w_scale = (2.0 / dim_in) ** 0.5  # equalized-lr He constant (lrMul = 1)

    # ---- style GEMM hoisted out of the kernel (tiny; XLA handles it) ----
    style = (y.astype(jnp.float32) @ weight.astype(jnp.float32).T
             + bias.astype(jnp.float32)) * w_scale                  # (B, 2C) f32
    ya = style[:, :dim_out].reshape(BC, 1)                          # per-row scale
    yb = style[:, dim_out:].reshape(BC, 1)                          # per-row shift
    st = jnp.concatenate([ya, yb], axis=1)                          # (BC, 2) f32

    x2 = x.reshape(BC, HW)
    itemsize = x2.dtype.itemsize

    if HW % 128 != 0:
        # Tiny spatial scales: masked partial stores would dominate; pure JAX.
        xf = x2.astype(jnp.float32)
        mu = jnp.mean(xf, axis=1, keepdims=True)
        var = jnp.maximum(jnp.mean(xf * xf, axis=1, keepdims=True) - mu * mu, 0.0)
        inv = lax.rsqrt(var + eps)
        out = (ya * (xf - mu) * inv + yb).astype(x.dtype)
        return out.reshape(B, C, H, W)

    vmem_limit = _vmem_limit_bytes()
    # Working set ~ 4x block (in + out, double-buffered) + tiny style buffers.
    target = max_block_bytes if max_block_bytes is not None else max(vmem_limit // 8, 1 << 20)
    sublane = _sublane_multiple(itemsize)
    rt, fits = _pick_row_tile(BC, HW, itemsize, sublane, target)

    inv_hw = 1.0 / HW
    eps = float(eps)

    if fits:
        # -------- single-pass path: full HW resident per block --------
        grid = (BC // rt,)
        out = pl.pallas_call(
            functools.partial(adain_rows_kernel, eps=eps, inv_hw=inv_hw),
            out_shape=jax.ShapeDtypeStruct((BC, HW), x.dtype),
            grid_spec=pltpu.PrefetchScalarGridSpec(
                num_scalar_prefetch=0,
                grid=grid,
                in_specs=[
                    pl.BlockSpec((rt, HW), lambda r: (r, 0)),
                    pl.BlockSpec((rt, 2), lambda r: (r, 0)),
                ],
                out_specs=pl.BlockSpec((rt, HW), lambda r: (r, 0)),
            ),
            compiler_params=pltpu.CompilerParams(
                dimension_semantics=("parallel",),
                vmem_limit_bytes=vmem_limit,
            ),
            cost_estimate=pl.CostEstimate(
                flops=6 * BC * HW,
                transcendentals=BC,
                bytes_accessed=2 * BC * HW * itemsize + BC * 2 * 4,
            ),
        )(x2, st)
        return out.reshape(B, C, H, W)

    # -------- two-pass path: HW tiled, bounded VMEM (large feature maps) ----
    hwt = _pick_hw_tile(HW, rt, itemsize, target)
    n_r = BC // rt
    n_h = HW // hwt

    ab = pl.pallas_call(
        functools.partial(adain_stats_kernel, eps=eps, inv_hw=inv_hw),
        out_shape=jax.ShapeDtypeStruct((BC, 2), jnp.float32),
        grid_spec=pltpu.PrefetchScalarGridSpec(
            num_scalar_prefetch=0,
            grid=(n_r, n_h),
            in_specs=[
                pl.BlockSpec((rt, hwt), lambda r, h: (r, h)),
                pl.BlockSpec((rt, 2), lambda r, h: (r, 0)),
            ],
            out_specs=pl.BlockSpec((rt, 2), lambda r, h: (r, 0)),
            scratch_shapes=[
                pltpu.VMEM((rt, 1), jnp.float32),
                pltpu.VMEM((rt, 1), jnp.float32),
            ],
        ),
        compiler_params=pltpu.CompilerParams(
            dimension_semantics=("parallel", "arbitrary"),
            vmem_limit_bytes=vmem_limit,
        ),
        cost_estimate=pl.CostEstimate(
            flops=3 * BC * HW,
            transcendentals=BC,
            bytes_accessed=BC * HW * itemsize + BC * 2 * 4,
        ),
    )(x2, st)

    out = pl.pallas_call(
        adain_apply_kernel,
        out_shape=jax.ShapeDtypeStruct((BC, HW), x.dtype),
        grid_spec=pltpu.PrefetchScalarGridSpec(
            num_scalar_prefetch=0,
            grid=(n_r, n_h),
            in_specs=[
                pl.BlockSpec((rt, hwt), lambda r, h: (r, h)),
                pl.BlockSpec((rt, 2), lambda r, h: (r, 0)),
            ],
            out_specs=pl.BlockSpec((rt, hwt), lambda r, h: (r, h)),
        ),
        compiler_params=pltpu.CompilerParams(
            dimension_semantics=("parallel", "parallel"),
            vmem_limit_bytes=vmem_limit,
        ),
        cost_estimate=pl.CostEstimate(
            flops=2 * BC * HW,
            transcendentals=0,
            bytes_accessed=2 * BC * HW * itemsize + BC * 2 * 4,
        ),
    )(x2, ab)
    return out.reshape(B, C, H, W)


# ----------------------------------------------------------------------------
# Pure-JAX reference matching the PyTorch forward
# ----------------------------------------------------------------------------

def adain_ref(x, y, weight, bias, dim_out, eps=1e-8):
    B, C, H, W = x.shape
    xf = x.astype(jnp.float32)
    t = xf.reshape(B, C, -1)
    mu = t.mean(axis=2).reshape(B, C, 1, 1)
    var = jnp.clip((t * t).mean(axis=2).reshape(B, C, 1, 1) - mu * mu, 0.0)
    inv = lax.rsqrt(var + eps)
    xn = (xf - mu) * inv
    c = (2.0 / y.shape[1]) ** 0.5
    style = (y.astype(jnp.float32) @ weight.astype(jnp.float32).T
             + bias.astype(jnp.float32)) * c
    yA = style[:, :dim_out].reshape(B, dim_out, 1, 1)
    yB = style[:, dim_out:].reshape(B, dim_out, 1, 1)
    return yA * xn + yB


if __name__ == "__main__":
    B, dim_in, dim_out, H, W = 2, 8, 4, 16, 16
    eps = 1e-8

    key = jax.random.PRNGKey(0)
    kx, ky, kw = jax.random.split(key, 3)
    x = jax.random.normal(kx, (B, dim_out, H, W), dtype=jnp.float32)
    y = jax.random.normal(ky, (B, dim_in), dtype=jnp.float32)
    # EqualizedLinear(dimIn, 2*dimOut, equalized=True, initBiasToZero=True):
    #   weight ~ N(0, 1), bias = 0, output scaled by sqrt(2 / dimIn).
    weight = jax.random.normal(kw, (2 * dim_out, dim_in), dtype=jnp.float32)
    bias = jnp.zeros((2 * dim_out,), dtype=jnp.float32)

    ref = adain_ref(x, y, weight, bias, dim_out, eps=eps)

    # 1) Default (single-pass, rows-tiled) path, f32.
    out = jax.block_until_ready(adain_forward(x, y, weight, bias, dim_out, eps=eps))
    assert out.shape == (B, dim_out, H, W)
    assert jnp.allclose(out, ref, atol=1e-5, rtol=1e-5), "single-pass mismatch"

    # 2) Force the two-pass HW-tiled path (as used for large feature maps).
    out2 = jax.block_until_ready(
        adain_forward(x, y, weight, bias, dim_out, eps=eps, max_block_bytes=4096))
    assert jnp.allclose(out2, ref, atol=1e-4, rtol=1e-4), "two-pass mismatch"

    # 3) bf16 activations (f32 stats in-kernel, bf16 in/out traffic).
    x_bf = x.astype(jnp.bfloat16)
    ref_bf = adain_ref(x_bf, y, weight, bias, dim_out, eps=eps)
    out_bf = jax.block_until_ready(
        adain_forward(x_bf, y, weight, bias, dim_out, eps=eps))
    assert out_bf.dtype == jnp.bfloat16
    assert jnp.allclose(out_bf.astype(jnp.float32), ref_bf, atol=5e-2, rtol=5e-2), \
        "bf16 mismatch"

    print("KERNEL_OK")
</pallas_src>

<mosaic_0001>
module attributes {stable_mosaic.version = 11 : i64} {
  func.func @adain_rows_kernel(%arg0: i32, %arg1: memref<8x256xf32, #tpu.memory_space<vmem>>, %arg2: memref<8x2xf32, #tpu.memory_space<vmem>>, %arg3: memref<8x256xf32, #tpu.memory_space<vmem>>) attributes {dimension_semantics = [#tpu.dimension_semantics<parallel>], iteration_bounds = array<i64: 1>, scalar_prefetch = 0 : i64, scratch_operands = 0 : i64, tpu.core_type = #tpu.core_type<tc>, window_params = [{transform_indices = @transform_0, window_bounds = array<i64: 8, 256>}, {transform_indices = @transform_1, window_bounds = array<i64: 8, 2>}, {transform_indices = @transform_2, window_bounds = array<i64: 8, 256>}]} {
    %c0 = arith.constant 0 : index
    %c0_0 = arith.constant 0 : index
    %0 = vector.load %arg1[%c0, %c0_0] : memref<8x256xf32, #tpu.memory_space<vmem>>, vector<8x256xf32>
    %cst = arith.constant dense<0.000000e+00> : vector<8xf32>
    %1 = vector.multi_reduction <add>, %0, %cst [1] : vector<8x256xf32> to vector<8xf32>
    %2 = vector.shape_cast %1 : vector<8xf32> to vector<8x1xf32>
    %cst_1 = arith.constant 3.906250e-03 : f32
    %3 = vector.broadcast %cst_1 : f32 to vector<8x1xf32>
    %4 = arith.mulf %2, %3 : vector<8x1xf32>
    %5 = arith.mulf %0, %0 : vector<8x256xf32>
    %cst_2 = arith.constant dense<0.000000e+00> : vector<8xf32>
    %6 = vector.multi_reduction <add>, %5, %cst_2 [1] : vector<8x256xf32> to vector<8xf32>
    %7 = vector.shape_cast %6 : vector<8xf32> to vector<8x1xf32>
    %cst_3 = arith.constant 3.906250e-03 : f32
    %8 = vector.broadcast %cst_3 : f32 to vector<8x1xf32>
    %9 = arith.mulf %7, %8 : vector<8x1xf32>
    %10 = arith.mulf %4, %4 : vector<8x1xf32>
    %11 = arith.subf %9, %10 : vector<8x1xf32>
    %cst_4 = arith.constant 0.000000e+00 : f32
    %12 = vector.broadcast %cst_4 : f32 to vector<8x1xf32>
    %13 = arith.maximumf %11, %12 : vector<8x1xf32>
    %cst_5 = arith.constant 9.99999993E-9 : f32
    %14 = vector.broadcast %cst_5 : f32 to vector<8x1xf32>
    %15 = arith.addf %13, %14 : vector<8x1xf32>
    %16 = math.rsqrt %15 : vector<8x1xf32>
    %c0_6 = arith.constant 0 : index
    %c0_7 = arith.constant 0 : index
    %17 = vector.load %arg2[%c0_6, %c0_7] : memref<8x2xf32, #tpu.memory_space<vmem>>, vector<8x2xf32>
    %18 = vector.extract_strided_slice %17 {offsets = [0, 0], sizes = [8, 1], strides = [1, 1]} : vector<8x2xf32> to vector<8x1xf32>
    %19 = arith.mulf %18, %16 : vector<8x1xf32>
    %20 = vector.extract_strided_slice %17 {offsets = [0, 1], sizes = [8, 1], strides = [1, 1]} : vector<8x2xf32> to vector<8x1xf32>
    %21 = arith.mulf %4, %19 : vector<8x1xf32>
    %22 = arith.subf %20, %21 : vector<8x1xf32>
    %c0_8 = arith.constant 0 : index
    %c0_9 = arith.constant 0 : index
    %23 = vector.load %arg1[%c0_8, %c0_9] : memref<8x256xf32, #tpu.memory_space<vmem>>, vector<8x256xf32>
    %24 = vector.broadcast %19 : vector<8x1xf32> to vector<8x256xf32>
    %25 = arith.mulf %23, %24 : vector<8x256xf32>
    %26 = vector.broadcast %22 : vector<8x1xf32> to vector<8x256xf32>
    %27 = arith.addf %25, %26 : vector<8x256xf32>
    %c0_10 = arith.constant 0 : index
    %c0_11 = arith.constant 0 : index
    %28 = vector.load %arg3[%c0_10, %c0_11] : memref<8x256xf32, #tpu.memory_space<vmem>>, vector<8x256xf32>
    tpu.vector_store %arg3[%c0_10, %c0_11], %27 {strides = array<i32>} : memref<8x256xf32, #tpu.memory_space<vmem>>, vector<8x256xf32>,
    return
  }
  func.func @transform_0(%arg0: i32) -> (i32, i32) {
    %c0_i32 = arith.constant 0 : i32
    %c0_i32_0 = arith.constant 0 : i32
    return %arg0, %c0_i32 : i32, i32
  }
  func.func @transform_1(%arg0: i32) -> (i32, i32) {
    %c0_i32 = arith.constant 0 : i32
    %c0_i32_0 = arith.constant 0 : i32
    return %arg0, %c0_i32 : i32, i32
  }
  func.func @transform_2(%arg0: i32) -> (i32, i32) {
    %c0_i32 = arith.constant 0 : i32
    %c0_i32_0 = arith.constant 0 : i32
    return %arg0, %c0_i32 : i32, i32
  }
}

</mosaic_0001>

<bundles_post_ra>
// kernel: tpu_custom_call.1
= control target key start
LH: loop header
LB: loop body
LE: loop exit
PB: predicated region body
PF: predicated region fallthrough
CT: control target
= control target key end

     0   :  { %7 = vsyncpa [#allocation3], 0  ;;  %s184_s0 = inlined_call_operand.hbm [shape: f32[8,256], index: 0, kind: input, shape index: {}]   ;;  %s185_s1 = inlined_call_operand.vmem [shape: f32[8,2], index: 1, kind: input, shape index: {}]   ;;  %s186_s2 = inlined_call_operand.hbm [shape: f32[8,256], index: 2, kind: output, shape index: {}]  }
   0x1   :  { %8 = vsyncpa [#allocation4], 0  ;;  %s137_s9 = smov [#allocation2]   ;;  %s89_s13 = scalar_lea.hbm %s184_s0, 256 }
   0x2   :  { %s15_s10 = sshll.u32 %s137_s9, 4  ;;  %p90_p0 = scmp.ne.s32.totalorder %s184_s0, %s89_s13  ;;  %s16_s10 = int_to_ptr.vmem [resolvable:$true] %s15_s10 }
   0x3   :  { %p93_p1 = scmp.lt.u32.totalorder %s89_s13, %s184_s0 }
   0x5   :  { %p95_p2 = pnand %p93_p1, %p90_p0 }
   0x7   :  { %98 = shalt.err (!%p95_p2)
}
   0x8   :  { %s99_s18 = scalar_lea.vmem %s16_s10, 256  ;;  %p104_p4 = scmp.lt.s32.totalorder %s16_s10, %s16_s10 }
   0x9   :  { %p100_p3 = scmp.ne.s32.totalorder %s16_s10, %s99_s18  ;;  %p105_p5 = scmp.lt.s32.totalorder %s99_s18, %s99_s18 }
   0xb   :  { %p106_p6 = por %p105_p5, %p104_p4 }
   0xd   :  { %p107_p7 = pnand %p106_p6, %p100_p3 }
   0xf   :  { %110 = shalt.err (!%p107_p7)
}
  0x10   :  { %18 = dma.hbm_to_vmem [thread:$0]  %s184_s0, 256, %s16_s10, [#allocation3]  }
  0x11   :  { %133 = dma.done.wait [#allocation3], 256  }
  0x12   :  { %134 = vsyncadd [#allocation3], 4294967040  ;;  %v24_v0 = vld [vmem:[#allocation2] sm:$0xff]  ;;  %v25_v1 = vld [vmem:[#allocation2 + $0x8] sm:$0xff]  ;;  %v138_v6 = vmov 0   ;;  %v139_v15 = vmov 1  }
  0x13   :  { %v26_v2 = vadd.f32 %v25_v1, %v24_v0  ;;  %v30_v3 = vmul.f32 %v24_v0, %v24_v0  ;;  %v31_v4 = vmul.f32 %v25_v1, %v25_v1  ;;  %85 = vset.pattern.permute.xlu1 %v138_v6  ;;  %86 = vset.pattern.permute.xlu0 %v139_v15  ;;  %v41_v16 = vld [vmem:[%s185_s1] sm:$0xff]  ;;  %s140_s22 = smov 1   ;;  %s141_s23 = smov [#allocation5]  }
  0x14   :  { %s71_s24 = sshll.u32 %s141_s23, 4  ;;  %s72_s24 = int_to_ptr.vmem [resolvable:$true] %s71_s24 }
  0x15   :  { %27 = vadd.xlane.f32.xlu0 %v26_v2  ;;  %v32_v5 = vadd.f32 %v31_v4, %v30_v3  ;;  %s111_s1 = scalar_lea.vmem %s72_s24, 256  ;;  %p116_p9 = scmp.lt.s32.totalorder %s72_s24, %s72_s24 }
  0x16   :  { %p112_p8 = scmp.ne.s32.totalorder %s72_s24, %s111_s1  ;;  %p117_p10 = scmp.lt.s32.totalorder %s111_s1, %s111_s1 }
  0x18   :  { %p118_p11 = por %p117_p10, %p116_p9 }
  0x19   :  { %33 = vadd.xlane.f32.xlu0 %v32_v5 }
  0x1a   :  { %p119_p12 = pnand %p118_p11, %p112_p8 }
  0xa2   :  { %v28_v7 = vpop.xlane.xlu0 %27 }
  0xa3   :  { %v29_v8 = vmul.f32 0.00390625, %v28_v7 }
  0xa5   :  { %v36_v10 = vmul.f32 %v29_v8, %v29_v8 }
  0xa6   :  { %v34_v9 = vpop.xlane.xlu0 %33 }
  0xa7   :  { %v35_v11 = vmul.f32 0.00390625, %v34_v9 }
  0xa9   :  { %v37_v12 = vsub.f32 %v35_v11, %v36_v10 }
  0xab   :  { %v38_v13 = vmax.f32 %v37_v12, 0.0 }
  0xad   :  { %v39_v14 = vadd.f32 1e-08, %v38_v13 }
  0xaf   :  { %87 = vrsqrt.f32 %v39_v14 }
  0xb9   :  { %v88_v17 = vpop.eup %87 }
  0xba   :  { %v42_v18 = vmul.f32 %v88_v17, %v41_v16 }
  0xbc   :  { %v43_v19 = vmul.f32 %v42_v18, %v29_v8 }
  0xbe   :  { %45 = vrot.lane.b32.xlu1 %v43_v19, %s140_s22 }
  0xc2   :  { %51 = vperm.xlu1 %85, %v42_v18  }
 0x130   :  { %v46_v20 = vpop.permute.xlu1 %45 }
 0x131   :  { %v48_v21 = vsub.f32 %v41_v16, %v46_v20 }
 0x133   :  { %58 = vperm.xlu0 %86, %v48_v21  }
 0x141   :  { %v52_v22 = vpop.permute.xlu1 %51 }
 0x142   :  { %v54_v23 = vmul.f32 %v52_v22, %v24_v0  ;;  %v55_v24 = vmul.f32 %v52_v22, %v25_v1 }
 0x1b2   :  { %v59_v25 = vpop.permute.xlu0 %58 }
 0x1b3   :  { %v61_v26 = vadd.f32 %v59_v25, %v54_v23  ;;  %v62_v27 = vadd.f32 %v59_v25, %v55_v24 }
 0x1b5   :  { %63 = vst [vmem:[#allocation5] sm:$0xff] %v61_v26  ;;  %64 = vst [vmem:[#allocation5 + $0x8] sm:$0xff] %v62_v27 }
 0x1b6   :  { %122 = shalt.err (!%p119_p12)
}
 0x1b7   :  { %s123_s27 = scalar_lea.hbm %s186_s2, 256 }
 0x1b8   :  { %p124_p13 = scmp.ne.s32.totalorder %s186_s2, %s123_s27  ;;  %p127_p0 = scmp.lt.u32.totalorder %s123_s27, %s186_s2 }
 0x1ba   :  { %p129_p1 = pnand %p127_p0, %p124_p13 }
 0x1bc   :  { %132 = shalt.err (!%p129_p1)
}
 0x1bd   :  { %74 = dma.vmem_to_hbm [thread:$0]  %s72_s24, 256, %s186_s2, [#allocation4]  }
 0x1be   :  { %135 = dma.done.wait [#allocation4], 256  }
 0x1bf   :  { %136 = vsyncadd [#allocation4], 4294967040 }
 0x1c0   :  { %78 = vsyncpa [#allocation3], 1 }
 0x1c1   :  { %79 = vsyncpa [#allocation4], 1 }

</bundles_post_ra>
